<compile_context>
chip_gen: v7x
topology: tpu7x:2x2x1
jax: 0.10.0
libtpu: 0.0.40
codegen_flags: <defaults>
</compile_context>

<pallas_src>
import jax
import jax.numpy as jnp
from jax.experimental import pallas as pl
from jax.experimental.pallas import tpu as pltpu


HIDDEN = 64     # nn.Linear(input_size, 64) / nn.Linear(64, 64)
LANE = 128
SUBLANE = 8


def _round_up(x, m):
    return ((x + m - 1) // m) * m


def _dense_multi_kernel(x_ref, w1_ref, b1_ref, w2_ref, b2_ref, w3p_ref, b3_ref,
                        o_ref):
    # x: (TILE_B, d_in) any float dtype; w1: (d_in, 64) bf16; w2: (64, 64) bf16;
    # w3p: (64, d_out_pad) bf16 (zero-padded lanes); b1/b2: (1, 64) f32;
    # b3: (1, d_out) f32. Output block: (TILE_B, d_out) f32.
    x = x_ref[...].astype(jnp.bfloat16)                    # VPU cast, no HBM cost

    h1 = jnp.dot(x, w1_ref[...], preferred_element_type=jnp.float32)
    h1 = jnp.maximum(h1 + b1_ref[...], 0.0)                # f32 bias + ReLU

    h2 = jnp.dot(h1.astype(jnp.bfloat16), w2_ref[...],
                 preferred_element_type=jnp.float32)
    h2 = jnp.maximum(h2 + b2_ref[...], 0.0)

    out = jnp.dot(h2.astype(jnp.bfloat16), w3p_ref[...],
                  preferred_element_type=jnp.float32)
    d_out = o_ref.shape[-1]
    o_ref[...] = (out[:, :d_out] + b3_ref[...]).astype(o_ref.dtype)


def prepare_params(params):
    """One-time preprocessing of the weights (hoisted out of the hot path).

    params: dict with w1 (D_in,64), b1 (1 or (1,64)), w2 (64,64), b2,
            w3 (64,D_out), b3; any float dtype.
    Returns a dict of device arrays ready for dense_multi_forward.
    """
    d_out = params["w3"].shape[1]
    d_out_pad = _round_up(max(d_out, LANE), LANE)   # MXU-operand padding only
    w3p = jnp.zeros((HIDDEN, d_out_pad), jnp.bfloat16)
    w3p = w3p.at[:, :d_out].set(params["w3"].astype(jnp.bfloat16))
    return {
        "w1": params["w1"].astype(jnp.bfloat16),
        "b1": params["b1"].astype(jnp.float32).reshape(1, HIDDEN),
        "w2": params["w2"].astype(jnp.bfloat16),
        "b2": params["b2"].astype(jnp.float32).reshape(1, HIDDEN),
        "w3p": w3p,
        "b3": params["b3"].astype(jnp.float32).reshape(1, d_out),
    }


def dense_multi_forward(x, prepared, *, max_tile_b=4096):
    """Forward pass of DenseMulti.

    x: (B, ...) — flattened (nn.Flatten) to (B, input_size).
    prepared: output of prepare_params().
    Returns (B, 1, D_out) float32 — matches torch.unsqueeze(out, 1).
    """
    b = x.shape[0]
    x2d = x.reshape(b, -1)
    d_in = x2d.shape[1]
    d_out = prepared["b3"].shape[1]
    d_out_pad = prepared["w3p"].shape[1]
    x_itemsize = x2d.dtype.itemsize

    weight_bytes = ((d_in * HIDDEN + HIDDEN * HIDDEN + HIDDEN * d_out_pad) * 2
                    + (2 * HIDDEN + d_out) * 4)

    # Generation-aware VMEM capacity (64 MiB/TC on v7x, 128 MiB on v5e/v6e).
    try:
        vmem_cap = int(pltpu.get_tpu_info().vmem_capacity_bytes)
    except Exception:
        vmem_cap = 64 << 20

    headroom = 8 << 20
    resident = 2 * weight_bytes                      # resident weights (conservative 2x)
    stream_budget = max(vmem_cap - headroom - resident, 4 << 20)

    # Per-batch-row VMEM cost: double-buffered x/out streams + in-kernel
    # intermediates (bf16 x copy, h1/h2 f32 + bf16 copies, padded matmul out,
    # pre-store result).
    per_row = (2 * (d_in * x_itemsize + d_out * 4)
               + d_in * 2
               + 2 * HIDDEN * (4 + 2)
               + d_out_pad * 4 + d_out * 4)

    tile_b = max(SUBLANE, min(int(stream_budget // per_row), int(max_tile_b)))
    tile_b = (tile_b // SUBLANE) * SUBLANE
    tile_b = min(tile_b, _round_up(b, SUBLANE))
    # Guarantee >=2 grid tiles when the batch allows it, so the "parallel"
    # batch axis can shard across both v7x TensorCores (harmless on v5e/v6e).
    if pl.cdiv(b, tile_b) == 1 and b > SUBLANE:
        tile_b = _round_up(pl.cdiv(b, 2), SUBLANE)
    n_tiles = pl.cdiv(b, tile_b)

    vmem_needed = resident + tile_b * per_row + (4 << 20)
    vmem_limit = int(min(max(vmem_needed, 32 << 20), int(vmem_cap * 0.9)))

    flops = 2 * b * (d_in * HIDDEN + HIDDEN * HIDDEN + HIDDEN * d_out_pad)
    bytes_accessed = b * d_in * x_itemsize + weight_bytes + b * d_out * 4
    cost = pl.CostEstimate(flops=flops, transcendentals=0,
                           bytes_accessed=bytes_accessed)

    out = pl.pallas_call(
        _dense_multi_kernel,
        out_shape=jax.ShapeDtypeStruct((b, d_out), jnp.float32),
        grid=(n_tiles,),
        in_specs=[
            pl.BlockSpec((tile_b, d_in), lambda i: (i, 0)),       # x (streamed)
            pl.BlockSpec((d_in, HIDDEN), lambda i: (0, 0)),       # w1 (resident)
            pl.BlockSpec((1, HIDDEN), lambda i: (0, 0)),          # b1
            pl.BlockSpec((HIDDEN, HIDDEN), lambda i: (0, 0)),     # w2
            pl.BlockSpec((1, HIDDEN), lambda i: (0, 0)),          # b2
            pl.BlockSpec((HIDDEN, d_out_pad), lambda i: (0, 0)),  # w3 (MXU-padded)
            pl.BlockSpec((1, d_out), lambda i: (0, 0)),           # b3 (unpadded)
        ],
        out_specs=pl.BlockSpec((tile_b, d_out), lambda i: (i, 0)),
        compiler_params=pltpu.CompilerParams(
            dimension_semantics=("parallel",),
            vmem_limit_bytes=vmem_limit),
        cost_estimate=cost,
    )(x2d, prepared["w1"], prepared["b1"], prepared["w2"], prepared["b2"],
      prepared["w3p"], prepared["b3"])

    return out[:, None, :]                           # torch.unsqueeze(out, 1)


def init_params(key, input_size, output_size):
    """Deterministic synthetic init (uniform, like PyTorch's default range)."""
    ks = jax.random.split(key, 6)

    def lin(kw, kb, fan_in, fan_out):
        bound = 1.0 / jnp.sqrt(jnp.float32(fan_in))
        w = jax.random.uniform(kw, (fan_in, fan_out), jnp.float32, -bound, bound)
        b = jax.random.uniform(kb, (1, fan_out), jnp.float32, -bound, bound)
        return w, b

    w1, b1 = lin(ks[0], ks[1], input_size, HIDDEN)
    w2, b2 = lin(ks[2], ks[3], HIDDEN, HIDDEN)
    w3, b3 = lin(ks[4], ks[5], HIDDEN, output_size)
    return {"w1": w1, "b1": b1, "w2": w2, "b2": b2, "w3": w3, "b3": b3}


if __name__ == "__main__":
    key = jax.random.PRNGKey(0)
    k_x, k_p = jax.random.split(key)

    # Small shapes consistent with the module: batch=8, window=8, features=4
    # -> flatten gives input_size=32; predict output_size=4 targets.
    batch, window, feats = 8, 8, 4
    input_size = window * feats
    output_size = 4

    x = jax.random.normal(k_x, (batch, window, feats), jnp.float32)
    params = init_params(k_p, input_size, output_size)
    prepared = prepare_params(params)          # one-time weight preprocessing

    out = dense_multi_forward(x, prepared)
    out = jax.block_until_ready(out)

    assert out.shape == (batch, 1, output_size), out.shape

    # Plain-JAX reference mirroring the kernel's bf16 matmul operands
    # (accumulation in f32), so tolerances stay tight.
    f32 = jnp.float32
    xb = x.reshape(batch, -1).astype(jnp.bfloat16).astype(f32)
    w1f = params["w1"].astype(jnp.bfloat16).astype(f32)
    w2f = params["w2"].astype(jnp.bfloat16).astype(f32)
    w3f = params["w3"].astype(jnp.bfloat16).astype(f32)
    h1 = jnp.maximum(xb @ w1f + params["b1"], 0.0)
    h1 = h1.astype(jnp.bfloat16).astype(f32)
    h2 = jnp.maximum(h1 @ w2f + params["b2"], 0.0)
    h2 = h2.astype(jnp.bfloat16).astype(f32)
    ref = (h2 @ w3f + params["b3"])[:, None, :]
    assert jnp.allclose(out, ref, atol=1e-2, rtol=1e-2), (
        float(jnp.max(jnp.abs(out - ref))))

    print("KERNEL_OK")
</pallas_src>

<mosaic_0001>
module attributes {stable_mosaic.version = 11 : i64} {
  func.func @_dense_multi_kernel(%arg0: i32, %arg1: memref<8x32xf32, #tpu.memory_space<vmem>>, %arg2: memref<32x64xbf16, #tpu.memory_space<vmem>>, %arg3: memref<1x64xf32, #tpu.memory_space<vmem>>, %arg4: memref<64x64xbf16, #tpu.memory_space<vmem>>, %arg5: memref<1x64xf32, #tpu.memory_space<vmem>>, %arg6: memref<64x128xbf16, #tpu.memory_space<vmem>>, %arg7: memref<1x4xf32, #tpu.memory_space<vmem>>, %arg8: memref<8x4xf32, #tpu.memory_space<vmem>>) attributes {dimension_semantics = [#tpu.dimension_semantics<parallel>], iteration_bounds = array<i64: 1>, scalar_prefetch = 0 : i64, scratch_operands = 0 : i64, tpu.core_type = #tpu.core_type<tc>, window_params = [{transform_indices = @transform_0, window_bounds = array<i64: 8, 32>}, {pipeline_mode = #tpu.pipeline_mode<synchronous>, transform_indices = @transform_1, window_bounds = array<i64: 32, 64>}, {pipeline_mode = #tpu.pipeline_mode<synchronous>, transform_indices = @transform_2, window_bounds = array<i64: 1, 64>}, {pipeline_mode = #tpu.pipeline_mode<synchronous>, transform_indices = @transform_3, window_bounds = array<i64: 64, 64>}, {pipeline_mode = #tpu.pipeline_mode<synchronous>, transform_indices = @transform_4, window_bounds = array<i64: 1, 64>}, {pipeline_mode = #tpu.pipeline_mode<synchronous>, transform_indices = @transform_5, window_bounds = array<i64: 64, 128>}, {pipeline_mode = #tpu.pipeline_mode<synchronous>, transform_indices = @transform_6, window_bounds = array<i64: 1, 4>}, {transform_indices = @transform_7, window_bounds = array<i64: 8, 4>}]} {
    %c0 = arith.constant 0 : index
    %c0_0 = arith.constant 0 : index
    %0 = vector.load %arg1[%c0, %c0_0] : memref<8x32xf32, #tpu.memory_space<vmem>>, vector<8x32xf32>
    %1 = arith.truncf %0 : vector<8x32xf32> to vector<8x32xbf16>
    %c0_1 = arith.constant 0 : index
    %c0_2 = arith.constant 0 : index
    %2 = vector.load %arg2[%c0_1, %c0_2] : memref<32x64xbf16, #tpu.memory_space<vmem>>, vector<32x64xbf16>
    %cst = arith.constant dense<0.000000e+00> : vector<8x64xf32>
    %3 = tpu.matmul %1, %2, %cst {dimension_numbers = #tpu.dot_dimension_numbers<[1], [0], [0], [1], [0, 0, 1, 1], [], []>} : vector<8x32xbf16>, vector<32x64xbf16>, vector<8x64xf32> -> vector<8x64xf32>
    %c0_3 = arith.constant 0 : index
    %c0_4 = arith.constant 0 : index
    %4 = vector.load %arg3[%c0_3, %c0_4] : memref<1x64xf32, #tpu.memory_space<vmem>>, vector<1x64xf32>
    %5 = vector.broadcast %4 : vector<1x64xf32> to vector<8x64xf32>
    %6 = arith.addf %3, %5 : vector<8x64xf32>
    %cst_5 = arith.constant 0.000000e+00 : f32
    %7 = vector.broadcast %cst_5 : f32 to vector<8x64xf32>
    %8 = arith.maximumf %6, %7 : vector<8x64xf32>
    %9 = arith.truncf %8 : vector<8x64xf32> to vector<8x64xbf16>
    %c0_6 = arith.constant 0 : index
    %c0_7 = arith.constant 0 : index
    %10 = vector.load %arg4[%c0_6, %c0_7] : memref<64x64xbf16, #tpu.memory_space<vmem>>, vector<64x64xbf16>
    %cst_8 = arith.constant dense<0.000000e+00> : vector<8x64xf32>
    %11 = tpu.matmul %9, %10, %cst_8 {dimension_numbers = #tpu.dot_dimension_numbers<[1], [0], [0], [1], [0, 0, 1, 1], [], []>} : vector<8x64xbf16>, vector<64x64xbf16>, vector<8x64xf32> -> vector<8x64xf32>
    %c0_9 = arith.constant 0 : index
    %c0_10 = arith.constant 0 : index
    %12 = vector.load %arg5[%c0_9, %c0_10] : memref<1x64xf32, #tpu.memory_space<vmem>>, vector<1x64xf32>
    %13 = vector.broadcast %12 : vector<1x64xf32> to vector<8x64xf32>
    %14 = arith.addf %11, %13 : vector<8x64xf32>
    %cst_11 = arith.constant 0.000000e+00 : f32
    %15 = vector.broadcast %cst_11 : f32 to vector<8x64xf32>
    %16 = arith.maximumf %14, %15 : vector<8x64xf32>
    %17 = arith.truncf %16 : vector<8x64xf32> to vector<8x64xbf16>
    %c0_12 = arith.constant 0 : index
    %c0_13 = arith.constant 0 : index
    %18 = vector.load %arg6[%c0_12, %c0_13] : memref<64x128xbf16, #tpu.memory_space<vmem>>, vector<64x128xbf16>
    %cst_14 = arith.constant dense<0.000000e+00> : vector<8x128xf32>
    %19 = tpu.matmul %17, %18, %cst_14 {dimension_numbers = #tpu.dot_dimension_numbers<[1], [0], [0], [1], [0, 0, 1, 1], [], []>} : vector<8x64xbf16>, vector<64x128xbf16>, vector<8x128xf32> -> vector<8x128xf32>
    %20 = vector.extract_strided_slice %19 {offsets = [0, 0], sizes = [8, 4], strides = [1, 1]} : vector<8x128xf32> to vector<8x4xf32>
    %c0_15 = arith.constant 0 : index
    %c0_16 = arith.constant 0 : index
    %21 = vector.load %arg7[%c0_15, %c0_16] : memref<1x4xf32, #tpu.memory_space<vmem>>, vector<1x4xf32>
    %22 = vector.broadcast %21 : vector<1x4xf32> to vector<8x4xf32>
    %23 = arith.addf %20, %22 : vector<8x4xf32>
    %c0_17 = arith.constant 0 : index
    %c0_18 = arith.constant 0 : index
    %24 = vector.load %arg8[%c0_17, %c0_18] : memref<8x4xf32, #tpu.memory_space<vmem>>, vector<8x4xf32>
    tpu.vector_store %arg8[%c0_17, %c0_18], %23 {strides = array<i32>} : memref<8x4xf32, #tpu.memory_space<vmem>>, vector<8x4xf32>,
    return
  }
  func.func @transform_0(%arg0: i32) -> (i32, i32) {
    %c0_i32 = arith.constant 0 : i32
    %c0_i32_0 = arith.constant 0 : i32
    return %arg0, %c0_i32 : i32, i32
  }
  func.func @transform_1(%arg0: i32) -> (i32, i32) {
    %c0_i32 = arith.constant 0 : i32
    %c0_i32_0 = arith.constant 0 : i32
    %c0_i32_1 = arith.constant 0 : i32
    return %c0_i32, %c0_i32_0 : i32, i32
  }
  func.func @transform_2(%arg0: i32) -> (i32, i32) {
    %c0_i32 = arith.constant 0 : i32
    %c0_i32_0 = arith.constant 0 : i32
    %c0_i32_1 = arith.constant 0 : i32
    return %c0_i32, %c0_i32_0 : i32, i32
  }
  func.func @transform_3(%arg0: i32) -> (i32, i32) {
    %c0_i32 = arith.constant 0 : i32
    %c0_i32_0 = arith.constant 0 : i32
    %c0_i32_1 = arith.constant 0 : i32
    return %c0_i32, %c0_i32_0 : i32, i32
  }
  func.func @transform_4(%arg0: i32) -> (i32, i32) {
    %c0_i32 = arith.constant 0 : i32
    %c0_i32_0 = arith.constant 0 : i32
    %c0_i32_1 = arith.constant 0 : i32
    return %c0_i32, %c0_i32_0 : i32, i32
  }
  func.func @transform_5(%arg0: i32) -> (i32, i32) {
    %c0_i32 = arith.constant 0 : i32
    %c0_i32_0 = arith.constant 0 : i32
    %c0_i32_1 = arith.constant 0 : i32
    return %c0_i32, %c0_i32_0 : i32, i32
  }
  func.func @transform_6(%arg0: i32) -> (i32, i32) {
    %c0_i32 = arith.constant 0 : i32
    %c0_i32_0 = arith.constant 0 : i32
    %c0_i32_1 = arith.constant 0 : i32
    return %c0_i32, %c0_i32_0 : i32, i32
  }
  func.func @transform_7(%arg0: i32) -> (i32, i32) {
    %c0_i32 = arith.constant 0 : i32
    %c0_i32_0 = arith.constant 0 : i32
    return %arg0, %c0_i32 : i32, i32
  }
}

</mosaic_0001>

<bundles_post_ra>
// kernel: tpu_custom_call.1
= control target key start
LH: loop header
LB: loop body
LE: loop exit
PB: predicated region body
PF: predicated region fallthrough
CT: control target
= control target key end

     0   :  { %12 = vsyncpa [#allocation3], 0  ;;  %s623_s0 = inlined_call_operand.hbm [shape: f32[8,32], index: 0, kind: input, shape index: {}]   ;;  %s624_s1 = inlined_call_operand.hbm [shape: bf16[32,64], index: 1, kind: input, shape index: {}]   ;;  %s625_s2 = inlined_call_operand.vmem [shape: f32[1,64], index: 2, kind: input, shape index: {}]   ;;  %s626_s3 = inlined_call_operand.hbm [shape: bf16[64,64], index: 3, kind: input, shape index: {}]   ;;  %s627_s4 = inlined_call_operand.vmem [shape: f32[1,64], index: 4, kind: input, shape index: {}]   ;;  %s628_s5 = inlined_call_operand.hbm [shape: bf16[64,128], index: 5, kind: input, shape index: {}]   ;;  %s629_s6 = inlined_call_operand.vmem [shape: f32[1,4], index: 6, kind: input, shape index: {}]   ;;  %s630_s7 = inlined_call_operand.vmem [shape: f32[8,4], index: 7, kind: output, shape index: {}]  }
   0x1   :  { %13 = vsyncpa [#allocation5], 0 }
   0x2   :  { %14 = vsyncpa [#allocation8], 0  ;;  %s501_s24 = smov [#allocation4]   ;;  %s407_s28 = scalar_lea.hbm %s624_s1, 256 }
   0x3   :  { %s30_s25 = sshll.u32 %s501_s24, 4  ;;  %p408_p0 = scmp.ne.s32.totalorder %s624_s1, %s407_s28  ;;  %s31_s25 = int_to_ptr.vmem [resolvable:$true] %s30_s25 }
   0x4   :  { %p411_p1 = scmp.lt.u32.totalorder %s407_s28, %s624_s1 }
   0x6   :  { %p413_p2 = pnand %p411_p1, %p408_p0 }
   0x8   :  { %416 = shalt.err (!%p413_p2)
}
   0x9   :  { %s417_s10 = scalar_lea.vmem %s31_s25, 256  ;;  %p422_p4 = scmp.lt.s32.totalorder %s31_s25, %s31_s25 }
   0xa   :  { %p418_p3 = scmp.ne.s32.totalorder %s31_s25, %s417_s10  ;;  %p423_p5 = scmp.lt.s32.totalorder %s417_s10, %s417_s10 }
   0xc   :  { %p424_p6 = por %p423_p5, %p422_p4 }
   0xe   :  { %p425_p7 = pnand %p424_p6, %p418_p3 }
  0x10   :  { %428 = shalt.err (!%p425_p7)
}
  0x11   :  { %s502_s11 = smov 64   ;;  %s503_s12 = smov 4  }
  0x12   :  { %36 = dma.hbm_to_vmem [thread:$0]  %s624_s1, 256, %s31_s25, [#allocation5], %s502_s11, %s502_s11, %s503_s12  }
  0x13   :  { %s504_s15 = smov [#allocation2]   ;;  %s505_s17 = smov [#allocation6]  }
  0x14   :  { %s21_s16 = sshll.u32 %s504_s15, 4  ;;  %s44_s18 = sshll.u32 %s505_s17, 4  ;;  %s22_s16 = int_to_ptr.vmem [resolvable:$true] %s21_s16  ;;  %s45_s18 = int_to_ptr.vmem [resolvable:$true] %s44_s18 }
  0x15   :  { %s429_s21 = scalar_lea.hbm %s623_s0, 128 }
  0x16   :  { %p430_p8 = scmp.ne.s32.totalorder %s623_s0, %s429_s21  ;;  %p433_p9 = scmp.lt.u32.totalorder %s429_s21, %s623_s0 }
  0x18   :  { %p435_p10 = pnand %p433_p9, %p430_p8 }
  0x1a   :  { %438 = shalt.err (!%p435_p10)
}
  0x1b   :  { %s439_s1 = scalar_lea.vmem %s22_s16, 128  ;;  %p444_p12 = scmp.lt.s32.totalorder %s22_s16, %s22_s16 }
  0x1c   :  { %p440_p11 = scmp.ne.s32.totalorder %s22_s16, %s439_s1  ;;  %p445_p13 = scmp.lt.s32.totalorder %s439_s1, %s439_s1 }
  0x1e   :  { %p446_p0 = por %p445_p13, %p444_p12 }
  0x20   :  { %p447_p1 = pnand %p446_p0, %p440_p11 }
  0x22   :  { %450 = shalt.err (!%p447_p1)
}
  0x23   :  { %24 = dma.hbm_to_vmem [thread:$0]  %s623_s0, 128, %s22_s16, [#allocation3]  }
  0x24   :  { %s451_s30 = scalar_lea.hbm %s626_s3, 512 }
  0x25   :  { %p452_p2 = scmp.ne.s32.totalorder %s626_s3, %s451_s30  ;;  %p455_p3 = scmp.lt.u32.totalorder %s451_s30, %s626_s3 }
  0x27   :  { %p457_p4 = pnand %p455_p3, %p452_p2 }
  0x29   :  { %460 = shalt.err (!%p457_p4)
}
  0x2a   :  { %s461_s14 = scalar_lea.vmem %s45_s18, 512  ;;  %p466_p6 = scmp.lt.s32.totalorder %s45_s18, %s45_s18 }
  0x2b   :  { %p462_p5 = scmp.ne.s32.totalorder %s45_s18, %s461_s14  ;;  %p467_p7 = scmp.lt.s32.totalorder %s461_s14, %s461_s14 }
  0x2d   :  { %p468_p8 = por %p467_p7, %p466_p6 }
  0x2f   :  { %p469_p9 = pnand %p468_p8, %p462_p5 }
  0x31   :  { %472 = shalt.err (!%p469_p9)
}
  0x32   :  { %50 = dma.hbm_to_vmem [thread:$0]  %s626_s3, 512, %s45_s18, [#allocation5], %s502_s11, %s502_s11, %s503_s12  }
  0x33   :  { %s506_s16 = smov [#allocation7]   ;;  %s473_s21 = scalar_lea.hbm %s628_s5, 512 }
  0x34   :  { %s58_s17 = sshll.u32 %s506_s16, 4  ;;  %p474_p10 = scmp.ne.s32.totalorder %s628_s5, %s473_s21  ;;  %s59_s17 = int_to_ptr.vmem [resolvable:$true] %s58_s17 }
  0x35   :  { %p477_p11 = scmp.lt.u32.totalorder %s473_s21, %s628_s5 }
  0x37   :  { %p479_p12 = pnand %p477_p11, %p474_p10 }
  0x39   :  { %482 = shalt.err (!%p479_p12)
}
  0x3a   :  { %s483_s1 = scalar_lea.vmem %s59_s17, 512  ;;  %p488_p0 = scmp.lt.s32.totalorder %s59_s17, %s59_s17 }
  0x3b   :  { %p484_p13 = scmp.ne.s32.totalorder %s59_s17, %s483_s1  ;;  %p489_p1 = scmp.lt.s32.totalorder %s483_s1, %s483_s1 }
  0x3d   :  { %p490_p2 = por %p489_p1, %p488_p0 }
  0x3f   :  { %p491_p3 = pnand %p490_p2, %p484_p13 }
  0x41   :  { %494 = shalt.err (!%p491_p3)
}
  0x42   :  { %64 = dma.hbm_to_vmem [thread:$0]  %s628_s5, 512, %s59_s17, [#allocation8], %s502_s11, %s502_s11, %s503_s12  }
  0x43   :  { %495 = dma.done.wait [#allocation3], 128  }
  0x44   :  { %496 = vsyncadd [#allocation3], 4294967168 }
  0x45   :  { %497 = dma.done.wait [#allocation5], 768  }
  0x46   :  { %498 = vsyncadd [#allocation5], 4294966528 }
  0x47   :  { %499 = dma.done.wait [#allocation8], 512  }
  0x48   :  { %500 = vsyncadd [#allocation8], 4294966784  ;;  %v507_v0 = vmov 0.0   ;;  %vm508_vm0 = vmmov 0   ;;  %v397_v1 = vld [vmem:[#allocation4] sm:$0xff]   ;;  %v398_v2 = vld [vmem:[#allocation4 + $0x8] sm:$0xff]  }
  0x49   :  { %357 = vmatprep.subr.bf16.mxu0 %v507_v0  ;;  %361 = vmatprep.mubr.msk.bf16.mxu0 %vm508_vm0, %v507_v0  ;;  %v80_v3 = vld [vmem:[#allocation2] sm:$0xff]  ;;  %v399_v4 = vld [vmem:[#allocation6] sm:$0xff]   ;;  %vm105_vm1 = vcmask 261120   ;;  %v401_v7 = vld [vmem:[#allocation6 + $0x10] sm:$0xff]   ;;  %vm190_vm2 = vcmask 523264   ;;  %vm319_vm3 = vcmask 31744  }
  0x4a   :  { %365 = vmatprep.subr.bf16.mxu1 %v507_v0  ;;  %373 = vmatprep.mubr.msk.bf16.mxu1 %vm508_vm0, %v507_v0  ;;  %v400_v5 = vld [vmem:[#allocation6 + $0x8] sm:$0xff]   ;;  %v81_v6 = vpack.c.bf16 %v80_v3, %v80_v3  ;;  %v402_v8 = vld [vmem:[#allocation6 + $0x18] sm:$0xff]   ;;  %v403_v9 = vld [vmem:[#allocation7] sm:$0xff]  }
  0x4b   :  { %358 = vmatpush3.bf16.msra.mxu0 %v397_v1  ;;  %366 = vmatpush3.bf16.msra.mxu1 %v399_v4  ;;  %v404_v10 = vld [vmem:[#allocation7 + $0x8] sm:$0xff]   ;;  %v405_v19 = vld [vmem:[#allocation7 + $0x10] sm:$0xff]   ;;  %v406_v20 = vld [vmem:[#allocation7 + $0x18] sm:$0xff]  }
  0x4c   :  { %359 = vmatprep.subr.bf16.mxu0 %v507_v0  ;;  %367 = vmatprep.subr.bf16.mxu1 %v507_v0  ;;  %v328_v11 = vld [vmem:[%s625_s2] ss:$0 sm:$0xff] }
  0x4d   :  { %v332_v21 = vld [vmem:[%s627_s4] ss:$0 sm:$0xff] }
  0x4e   :  { %v343_v29 = vld [vmem:[%s629_s6] ss:$0 sm:$0xff] }
  0x4f   :  { %360 = vmatpush3.bf16.msra.mxu0 %v398_v2  ;;  %368 = vmatpush3.bf16.msra.mxu1 %v400_v5 }
  0x50   :  { %377 = vmatprep.subr.bf16.mxu0 %v507_v0  ;;  %369 = vmatprep.subr.bf16.mxu1 %v507_v0 }
  0x52   :  { %362 = vmatmul.mubr.msk.bf16.vlgmr.msra.gmra.mrb[0].mxu0 %vm105_vm1, %v81_v6 }
  0x53   :  { %385 = vmatprep.mubr.msk.bf16.mxu0 %vm508_vm0, %v507_v0  ;;  %370 = vmatpush3.bf16.msra.mxu1 %v401_v7 }
  0x54   :  { %371 = vmatprep.subr.bf16.mxu1 %v507_v0  ;;  %378 = vmatpush3.bf16.msra.mxu0 %v403_v9 }
  0x55   :  { %379 = vmatprep.subr.bf16.mxu0 %v507_v0 }
  0x57   :  { %372 = vmatpush3.bf16.msra.mxu1 %v402_v8 }
  0x58   :  { %380 = vmatpush3.bf16.msra.mxu0 %v404_v10 }
  0x59   :  { %381 = vmatprep.subr.bf16.mxu0 %v507_v0 }
  0x5c   :  { %382 = vmatpush3.bf16.msra.mxu0 %v405_v19 }
  0x5d   :  { %383 = vmatprep.subr.bf16.mxu0 %v507_v0 }
  0x60   :  { %384 = vmatpush3.bf16.msra.mxu0 %v406_v20 }
 0x125   :  { %v143_v12 = vpop.f32.mrb[0].mxu0 }
 0x126   :  { %v144_v13 = vadd.f32 %v328_v11, %v143_v12  ;;  %v363_v14 = vpop.f32.mrb[1].mxu0 }
 0x127   :  { %v146_v15 = vpop.f32.mrb[2].mxu0 }
 0x128   :  { %v149_v16 = vmax.f32 %v144_v13, 0.0  ;;  %v364_v17 = vpop.f32.mrb[3].mxu0 }
 0x12a   :  { %v150_v18 = vpack.c.bf16 %v149_v16, %v149_v16 }
 0x12c   :  { %374 = vmatmul.mubr.msk.bf16.vlgmr.msra.gmra.mrb[0].mxu1 %vm190_vm2, %v150_v18 }
 0x1ff   :  { %v228_v22 = vpop.f32.mrb[0].mxu1 }
 0x200   :  { %v229_v23 = vadd.f32 %v332_v21, %v228_v22  ;;  %v375_v24 = vpop.f32.mrb[1].mxu1 }
 0x201   :  { %v231_v25 = vpop.f32.mrb[2].mxu1 }
 0x202   :  { %v234_v26 = vmax.f32 %v229_v23, 0.0  ;;  %v376_v27 = vpop.f32.mrb[3].mxu1 }
 0x204   :  { %v235_v28 = vpack.c.bf16 %v234_v26, %v234_v26 }
 0x206   :  { %386 = vmatmul.mubr.msk.bf16.vlgmr.msra.gmra.mrb[4].mxu0 %vm190_vm2, %v235_v28 }
 0x2d9   :  { %v305_v30 = vpop.f32.mrb[4].mxu0 }
 0x2da   :  { %v318_v31 = vadd.f32 %v343_v29, %v305_v30  ;;  %v387_v32 = vpop.f32.mrb[5].mxu0 }
 0x2db   :  { %v308_v33 = vpop.f32.mrb[6].mxu0 }
 0x2dc   :  { %320 = vst.msk [vmem:[%s630_s7] sm:$0xff] %vm319_vm3, %v318_v31  ;;  %v388_v34 = vpop.f32.mrb[7].mxu0 }
 0x2dd   :  { %325 = vsyncpa [#allocation3], 1 }
 0x2de   :  { %326 = vsyncpa [#allocation5], 1 }
 0x2df   :  { %327 = vsyncpa [#allocation8], 1 }

</bundles_post_ra>
